<compile_context>
chip_gen: v7x
topology: tpu7x:2x2x1
jax: 0.10.0
libtpu: 0.0.40
codegen_flags: <defaults>
</compile_context>

<pallas_src>
import functools

import jax
import jax.numpy as jnp
from jax.experimental import pallas as pl
from jax.experimental.pallas import tpu as pltpu

EPS = 1e-5                        # nn.LayerNorm default eps
_VMEM_BUDGET = 24 * 1024 * 1024   # tile-sizing budget; leaves headroom on v7x (64 MiB)
_VMEM_LIMIT = 32 * 1024 * 1024    # scoped VMEM limit (v5e default is only 16 MiB)


def _round_up(a, b):
    return (a + b - 1) // b * b


def _ctr_kernel(emb_ref, w_ref, b_ref, gamma_ref, beta_ref, o_ref, *, inv_d):
    # emb_ref: (tm, D)  w_ref: (D, D) = W^T  b/gamma/beta: (1, D)  o_ref: (tm, D)

    # Linear: x @ W^T (MXU), f32 accumulation even when inputs are bf16.
    h = jnp.dot(emb_ref[...], w_ref[...], preferred_element_type=jnp.float32)
    h = h + b_ref[...]

    # LayerNorm over the feature (lane) axis: sum * (1/D) instead of mean
    # (no divides); rsqrt goes to the EUP slot; gamma folded into the scale.
    mean = jnp.sum(h, axis=-1, keepdims=True) * inv_d
    centered = h - mean
    var = jnp.sum(centered * centered, axis=-1, keepdims=True) * inv_d
    scale = gamma_ref[...] * jax.lax.rsqrt(var + EPS)
    hn = centered * scale + beta_ref[...]

    # TODO(synk): Dropout omitted (identity / eval mode); PyTorch RNG masks are
    # not reproducible bit-for-bit anyway.
    # TODO(synk): for D < 128 a lane-dense repack of the output tile (e.g.
    # (tm, 32) -> (tm//4, 128)) would avoid masked vst; kept the natural layout
    # for lowering robustness since real configs have D >= 128.
    o_ref[...] = jnp.maximum(hn, 0.0).astype(o_ref.dtype)


def _pick_tile(n_rows, d, compute_bytes, requested=None):
    """Largest row tile (multiple of 8) fitting the VMEM budget / row count."""
    # Double-buffered pipeline allocations:
    #   W^T       : 2 * D*D * compute_bytes  (constant index_map -> DMA'd only
    #               once, but still holds two pipeline buffers of VMEM)
    #   bias/g/b  : 2 * 3 * D * 4
    #   emb tile  : 2 * tm*D * compute_bytes
    #   out tile  : 2 * tm*D * 4
    fixed = 2 * d * d * compute_bytes + 2 * 3 * d * 4
    per_row = 2 * d * compute_bytes + 2 * d * 4
    avail = max(_VMEM_BUDGET - fixed, per_row * 8)
    cap = max(8, (avail // per_row) // 8 * 8)
    tm = 512 if requested is None else requested
    tm = max(8, min(tm, cap, _round_up(n_rows, 8)))
    return _round_up(tm, 8)


def continuous_token_representation(x, embed_table, weight, bias, gamma, beta,
                                    *, tm=None):
    """x: int32 [B, S] token ids. Returns float32 [B, S, D]."""
    B, S = x.shape
    _, D = embed_table.shape
    N = B * S

    # bf16 matmul inputs when D is large (MXU throughput + halves the HBM
    # round-trip of the gathered slab); epilogue stays f32 everywhere.
    compute_dtype = jnp.bfloat16 if D >= 512 else jnp.float32
    compute_bytes = jnp.dtype(compute_dtype).itemsize

    tile = _pick_tile(N, D, compute_bytes, requested=tm)
    n_pad = _round_up(N, tile)

    # Glue: embedding gather (pure indexing) in plain JAX; pad with token id 0
    # so the grid divides evenly (padded rows are sliced off afterwards).
    ids = x.reshape(-1)
    if n_pad != N:
        ids = jnp.concatenate([ids, jnp.zeros((n_pad - N,), ids.dtype)])
    emb = embed_table[ids].astype(compute_dtype)           # [n_pad, D]

    wt = weight.T.astype(compute_dtype)    # PyTorch Linear: y = x @ W^T + b
    b2 = bias.reshape(1, D).astype(jnp.float32)
    g2 = gamma.reshape(1, D).astype(jnp.float32)
    be2 = beta.reshape(1, D).astype(jnp.float32)

    out = pl.pallas_call(
        functools.partial(_ctr_kernel, inv_d=1.0 / D),
        out_shape=jax.ShapeDtypeStruct((n_pad, D), jnp.float32),
        grid_spec=pltpu.PrefetchScalarGridSpec(
            num_scalar_prefetch=0,
            grid=(n_pad // tile,),
            in_specs=[
                pl.BlockSpec((tile, D), lambda i: (i, 0)),   # embedded rows
                pl.BlockSpec((D, D), lambda i: (0, 0)),      # W^T (resident)
                pl.BlockSpec((1, D), lambda i: (0, 0)),      # bias
                pl.BlockSpec((1, D), lambda i: (0, 0)),      # LN gamma
                pl.BlockSpec((1, D), lambda i: (0, 0)),      # LN beta
            ],
            out_specs=pl.BlockSpec((tile, D), lambda i: (i, 0)),
        ),
        compiler_params=pltpu.CompilerParams(
            dimension_semantics=("parallel",),   # row loop splits across v7x's 2 TCs
            vmem_limit_bytes=_VMEM_LIMIT,
        ),
    )(emb, wt, b2, g2, be2)

    return out[:N].reshape(B, S, D)


def _reference(x, embed_table, weight, bias, gamma, beta):
    emb = embed_table[x]                                     # [B, S, D]
    h = jnp.einsum("bsd,ed->bse", emb, weight) + bias        # Linear
    mean = jnp.mean(h, axis=-1, keepdims=True)
    var = jnp.mean((h - mean) ** 2, axis=-1, keepdims=True)
    hn = (h - mean) / jnp.sqrt(var + EPS)
    hn = hn * gamma + beta
    return jnp.maximum(hn, 0.0)


if __name__ == "__main__":
    # Small, deterministic configuration.
    vocab_size, embed_dim = 100, 32
    B, S = 2, 8

    key = jax.random.PRNGKey(0)
    k_ids, k_emb, k_w, k_b, k_g, k_be = jax.random.split(key, 6)

    x = jax.random.randint(k_ids, (B, S), 0, vocab_size, dtype=jnp.int32)
    embed_table = jax.random.normal(k_emb, (vocab_size, embed_dim), jnp.float32)
    weight = jax.random.normal(k_w, (embed_dim, embed_dim), jnp.float32) * 0.1
    bias = jax.random.normal(k_b, (embed_dim,), jnp.float32) * 0.1
    gamma = 1.0 + 0.05 * jax.random.normal(k_g, (embed_dim,), jnp.float32)
    beta = 0.05 * jax.random.normal(k_be, (embed_dim,), jnp.float32)

    out = continuous_token_representation(x, embed_table, weight, bias,
                                          gamma, beta)
    out = jax.block_until_ready(out)

    ref = _reference(x, embed_table, weight, bias, gamma, beta)
    assert out.shape == (B, S, embed_dim)
    assert jnp.allclose(out, ref, atol=1e-4, rtol=1e-4), "mismatch vs reference"

    print("KERNEL_OK")
</pallas_src>

<mosaic_0001>
module attributes {stable_mosaic.version = 11 : i64} {
  func.func @_ctr_kernel(%arg0: i32, %arg1: memref<16x32xf32, #tpu.memory_space<vmem>>, %arg2: memref<32x32xf32, #tpu.memory_space<vmem>>, %arg3: memref<1x32xf32, #tpu.memory_space<vmem>>, %arg4: memref<1x32xf32, #tpu.memory_space<vmem>>, %arg5: memref<1x32xf32, #tpu.memory_space<vmem>>, %arg6: memref<16x32xf32, #tpu.memory_space<vmem>>) attributes {dimension_semantics = [#tpu.dimension_semantics<parallel>], iteration_bounds = array<i64: 1>, scalar_prefetch = 0 : i64, scratch_operands = 0 : i64, tpu.core_type = #tpu.core_type<tc>, window_params = [{transform_indices = @transform_0, window_bounds = array<i64: 16, 32>}, {pipeline_mode = #tpu.pipeline_mode<synchronous>, transform_indices = @transform_1, window_bounds = array<i64: 32, 32>}, {pipeline_mode = #tpu.pipeline_mode<synchronous>, transform_indices = @transform_2, window_bounds = array<i64: 1, 32>}, {pipeline_mode = #tpu.pipeline_mode<synchronous>, transform_indices = @transform_3, window_bounds = array<i64: 1, 32>}, {pipeline_mode = #tpu.pipeline_mode<synchronous>, transform_indices = @transform_4, window_bounds = array<i64: 1, 32>}, {transform_indices = @transform_5, window_bounds = array<i64: 16, 32>}]} {
    %c0 = arith.constant 0 : index
    %c0_0 = arith.constant 0 : index
    %0 = vector.load %arg1[%c0, %c0_0] : memref<16x32xf32, #tpu.memory_space<vmem>>, vector<16x32xf32>
    %c0_1 = arith.constant 0 : index
    %c0_2 = arith.constant 0 : index
    %1 = vector.load %arg2[%c0_1, %c0_2] : memref<32x32xf32, #tpu.memory_space<vmem>>, vector<32x32xf32>
    %cst = arith.constant dense<0.000000e+00> : vector<16x32xf32>
    %2 = tpu.matmul %0, %1, %cst {dimension_numbers = #tpu.dot_dimension_numbers<[1], [0], [0], [1], [0, 0, 1, 1], [], []>} : vector<16x32xf32>, vector<32x32xf32>, vector<16x32xf32> -> vector<16x32xf32>
    %c0_3 = arith.constant 0 : index
    %c0_4 = arith.constant 0 : index
    %3 = vector.load %arg3[%c0_3, %c0_4] : memref<1x32xf32, #tpu.memory_space<vmem>>, vector<1x32xf32>
    %4 = vector.broadcast %3 : vector<1x32xf32> to vector<16x32xf32>
    %5 = arith.addf %2, %4 : vector<16x32xf32>
    %cst_5 = arith.constant dense<0.000000e+00> : vector<16xf32>
    %6 = vector.multi_reduction <add>, %5, %cst_5 [1] : vector<16x32xf32> to vector<16xf32>
    %7 = vector.shape_cast %6 : vector<16xf32> to vector<16x1xf32>
    %cst_6 = arith.constant 3.125000e-02 : f32
    %8 = vector.broadcast %cst_6 : f32 to vector<16x1xf32>
    %9 = arith.mulf %7, %8 : vector<16x1xf32>
    %10 = vector.broadcast %9 : vector<16x1xf32> to vector<16x32xf32>
    %11 = arith.subf %5, %10 : vector<16x32xf32>
    %12 = arith.mulf %11, %11 : vector<16x32xf32>
    %cst_7 = arith.constant dense<0.000000e+00> : vector<16xf32>
    %13 = vector.multi_reduction <add>, %12, %cst_7 [1] : vector<16x32xf32> to vector<16xf32>
    %14 = vector.shape_cast %13 : vector<16xf32> to vector<16x1xf32>
    %cst_8 = arith.constant 3.125000e-02 : f32
    %15 = vector.broadcast %cst_8 : f32 to vector<16x1xf32>
    %16 = arith.mulf %14, %15 : vector<16x1xf32>
    %c0_9 = arith.constant 0 : index
    %c0_10 = arith.constant 0 : index
    %17 = vector.load %arg4[%c0_9, %c0_10] : memref<1x32xf32, #tpu.memory_space<vmem>>, vector<1x32xf32>
    %cst_11 = arith.constant 9.99999974E-6 : f32
    %18 = vector.broadcast %cst_11 : f32 to vector<16x1xf32>
    %19 = arith.addf %16, %18 : vector<16x1xf32>
    %20 = math.rsqrt %19 : vector<16x1xf32>
    %21 = vector.broadcast %17 : vector<1x32xf32> to vector<16x32xf32>
    %22 = vector.broadcast %20 : vector<16x1xf32> to vector<16x32xf32>
    %23 = arith.mulf %21, %22 : vector<16x32xf32>
    %24 = arith.mulf %11, %23 : vector<16x32xf32>
    %c0_12 = arith.constant 0 : index
    %c0_13 = arith.constant 0 : index
    %25 = vector.load %arg5[%c0_12, %c0_13] : memref<1x32xf32, #tpu.memory_space<vmem>>, vector<1x32xf32>
    %26 = vector.broadcast %25 : vector<1x32xf32> to vector<16x32xf32>
    %27 = arith.addf %24, %26 : vector<16x32xf32>
    %cst_14 = arith.constant 0.000000e+00 : f32
    %28 = vector.broadcast %cst_14 : f32 to vector<16x32xf32>
    %29 = arith.maximumf %27, %28 : vector<16x32xf32>
    %c0_15 = arith.constant 0 : index
    %c0_16 = arith.constant 0 : index
    %30 = vector.load %arg6[%c0_15, %c0_16] : memref<16x32xf32, #tpu.memory_space<vmem>>, vector<16x32xf32>
    tpu.vector_store %arg6[%c0_15, %c0_16], %29 {strides = array<i32>} : memref<16x32xf32, #tpu.memory_space<vmem>>, vector<16x32xf32>,
    return
  }
  func.func @transform_0(%arg0: i32) -> (i32, i32) {
    %c0_i32 = arith.constant 0 : i32
    %c0_i32_0 = arith.constant 0 : i32
    return %arg0, %c0_i32 : i32, i32
  }
  func.func @transform_1(%arg0: i32) -> (i32, i32) {
    %c0_i32 = arith.constant 0 : i32
    %c0_i32_0 = arith.constant 0 : i32
    %c0_i32_1 = arith.constant 0 : i32
    return %c0_i32, %c0_i32_0 : i32, i32
  }
  func.func @transform_2(%arg0: i32) -> (i32, i32) {
    %c0_i32 = arith.constant 0 : i32
    %c0_i32_0 = arith.constant 0 : i32
    %c0_i32_1 = arith.constant 0 : i32
    return %c0_i32, %c0_i32_0 : i32, i32
  }
  func.func @transform_3(%arg0: i32) -> (i32, i32) {
    %c0_i32 = arith.constant 0 : i32
    %c0_i32_0 = arith.constant 0 : i32
    %c0_i32_1 = arith.constant 0 : i32
    return %c0_i32, %c0_i32_0 : i32, i32
  }
  func.func @transform_4(%arg0: i32) -> (i32, i32) {
    %c0_i32 = arith.constant 0 : i32
    %c0_i32_0 = arith.constant 0 : i32
    %c0_i32_1 = arith.constant 0 : i32
    return %c0_i32, %c0_i32_0 : i32, i32
  }
  func.func @transform_5(%arg0: i32) -> (i32, i32) {
    %c0_i32 = arith.constant 0 : i32
    %c0_i32_0 = arith.constant 0 : i32
    return %arg0, %c0_i32 : i32, i32
  }
}

</mosaic_0001>

<bundles_post_ra>
// kernel: tpu_custom_call.1
= control target key start
LH: loop header
LB: loop body
LE: loop exit
PB: predicated region body
PF: predicated region fallthrough
CT: control target
= control target key end

     0   :  { %10 = vsyncpa [#allocation3], 0  ;;  %s418_s0 = inlined_call_operand.hbm [shape: f32[16,32], index: 0, kind: input, shape index: {}]   ;;  %s419_s1 = inlined_call_operand.hbm [shape: f32[32,32], index: 1, kind: input, shape index: {}]   ;;  %s420_s2 = inlined_call_operand.vmem [shape: f32[1,32], index: 2, kind: input, shape index: {}]   ;;  %s421_s3 = inlined_call_operand.vmem [shape: f32[1,32], index: 3, kind: input, shape index: {}]   ;;  %s422_s4 = inlined_call_operand.vmem [shape: f32[1,32], index: 4, kind: input, shape index: {}]   ;;  %s423_s5 = inlined_call_operand.hbm [shape: f32[16,32], index: 5, kind: output, shape index: {}]  }
   0x1   :  { %11 = vsyncpa [#allocation6], 0 }
   0x2   :  { %12 = vsyncpa [#allocation4], 0  ;;  %s321_s18 = smov [#allocation2]   ;;  %s249_s22 = scalar_lea.hbm %s418_s0, 256 }
   0x3   :  { %s18_s19 = sshll.u32 %s321_s18, 4  ;;  %p250_p0 = scmp.ne.s32.totalorder %s418_s0, %s249_s22  ;;  %s19_s19 = int_to_ptr.vmem [resolvable:$true] %s18_s19 }
   0x4   :  { %p253_p1 = scmp.lt.u32.totalorder %s249_s22, %s418_s0 }
   0x6   :  { %p255_p2 = pnand %p253_p1, %p250_p0 }
   0x8   :  { %258 = shalt.err (!%p255_p2)
}
   0x9   :  { %s259_s27 = scalar_lea.vmem %s19_s19, 256  ;;  %p264_p4 = scmp.lt.s32.totalorder %s19_s19, %s19_s19 }
   0xa   :  { %p260_p3 = scmp.ne.s32.totalorder %s19_s19, %s259_s27  ;;  %p265_p5 = scmp.lt.s32.totalorder %s259_s27, %s259_s27 }
   0xc   :  { %p266_p6 = por %p265_p5, %p264_p4 }
   0xe   :  { %p267_p7 = pnand %p266_p6, %p260_p3 }
  0x10   :  { %270 = shalt.err (!%p267_p7)
}
  0x11   :  { %s322_s28 = smov 128   ;;  %s323_s29 = smov 8  }
  0x12   :  { %24 = dma.hbm_to_vmem [thread:$0]  %s418_s0, 256, %s19_s19, [#allocation3], %s322_s28, %s322_s28, %s323_s29  }
  0x13   :  { %s324_s7 = smov [#allocation5]   ;;  %s271_s11 = scalar_lea.hbm %s419_s1, 512 }
  0x14   :  { %s30_s8 = sshll.u32 %s324_s7, 4  ;;  %p272_p8 = scmp.ne.s32.totalorder %s419_s1, %s271_s11  ;;  %s31_s8 = int_to_ptr.vmem [resolvable:$true] %s30_s8 }
  0x15   :  { %p275_p9 = scmp.lt.u32.totalorder %s271_s11, %s419_s1 }
  0x17   :  { %p277_p10 = pnand %p275_p9, %p272_p8 }
  0x19   :  { %280 = shalt.err (!%p277_p10)
}
  0x1a   :  { %s281_s16 = scalar_lea.vmem %s31_s8, 512  ;;  %p286_p12 = scmp.lt.s32.totalorder %s31_s8, %s31_s8 }
  0x1b   :  { %p282_p11 = scmp.ne.s32.totalorder %s31_s8, %s281_s16  ;;  %p287_p13 = scmp.lt.s32.totalorder %s281_s16, %s281_s16 }
  0x1d   :  { %p288_p0 = por %p287_p13, %p286_p12 }
  0x1f   :  { %p289_p1 = pnand %p288_p0, %p282_p11 }
  0x21   :  { %292 = shalt.err (!%p289_p1)
}
  0x22   :  { %36 = dma.hbm_to_vmem [thread:$0]  %s419_s1, 512, %s31_s8, [#allocation6], %s322_s28, %s322_s28, %s323_s29  }
  0x23   :  { %315 = dma.done.wait [#allocation3], 256  }
  0x24   :  { %316 = vsyncadd [#allocation3], 4294967040 }
  0x25   :  { %317 = dma.done.wait [#allocation6], 512  }
  0x26   :  { %318 = vsyncadd [#allocation6], 4294966784  ;;  %vm62_vm0 = vcmask 261120   ;;  %v51_v0 = vld [vmem:[#allocation5] sm:$0xff]  ;;  %v52_v1 = vld [vmem:[#allocation5 + $0x8] sm:$0xff]  ;;  %s325_s22 = smov [#allocation7]  }
  0x27   :  { %v53_v2 = vld [vmem:[#allocation5 + $0x10] sm:$0xff]  ;;  %v232_v3 = vpack.c.bf16 %v52_v1, %v51_v0  ;;  %v54_v4 = vld [vmem:[#allocation5 + $0x18] sm:$0xff]  ;;  %s197_s23 = sshll.u32 %s325_s22, 4  ;;  %s198_s23 = int_to_ptr.vmem [resolvable:$true] %s197_s23 }
  0x28   :  { %v49_v5 = vld [vmem:[#allocation2] sm:$0xff]  ;;  %v236_v6 = vpack.c.bf16 %v54_v4, %v53_v2  ;;  %v50_v7 = vld [vmem:[#allocation2 + $0x8] sm:$0xff]  ;;  %p298_p3 = scmp.lt.s32.totalorder %s198_s23, %s198_s23 }
  0x29   :  { %229 = vmatprep.mubr.msk.f32.mxu0 %vm62_vm0, %v49_v5  ;;  %233 = vmatprep.subr.bf16.mxu0 %v232_v3  ;;  %v210_v8 = vld [vmem:[%s420_s2] ss:$0 sm:$0xff] }
  0x2a   :  { %235 = vmatpush3.bf16.msra.mxu0 %v232_v3  ;;  %v213_v31 = vld [vmem:[%s421_s3] ss:$0 sm:$0xff]  ;;  %s293_s3 = scalar_lea.vmem %s198_s23, 256 }
  0x2b   :  { %237 = vmatprep.subr.bf16.mxu0 %v236_v6  ;;  %v214_v34 = vld [vmem:[%s422_s4] ss:$0 sm:$0xff]  ;;  %p294_p2 = scmp.ne.s32.totalorder %s198_s23, %s293_s3  ;;  %p299_p4 = scmp.lt.s32.totalorder %s293_s3, %s293_s3 }
  0x2d   :  { %p300_p5 = por %p299_p4, %p298_p3 }
  0x2e   :  { %239 = vmatpush3.bf16.msra.mxu0 %v236_v6 }
  0x2f   :  { %p301_p6 = pnand %p300_p5, %p294_p2 }
  0x31   :  { %230 = vmatmul.mubr.msk.f32.vlgmr.msra.gmra.mrb[0].mxu0 %vm62_vm0, %v50_v7 }
 0x104   :  { %v231_v9 = vpop.f32.mrb[0].mxu0 }
 0x105   :  { %v135_v10 = vpop.f32.mrb[1].mxu0  ;;  %v141_v12 = vadd.f32 %v231_v9, %v210_v8 }
 0x106   :  { %v136_v11 = vadd.f32 %v210_v8, %v135_v10 }
 0x107   :  { %v147_v14 = vsel %vm62_vm0, %v141_v12, 0.0 }
 0x108   :  { %v144_v13 = vsel %vm62_vm0, %v136_v11, 0.0 }
 0x109   :  { %145 = vadd.xlane.f32.xlu0 %v144_v13 }
 0x10d   :  { %148 = vadd.xlane.f32.xlu0 %v147_v14 }
 0x196   :  { %v146_v15 = vpop.xlane.xlu0 %145 }
 0x197   :  { %v150_v16 = vmul.f32 0.03125, %v146_v15 }
 0x199   :  { %v152_v17 = vsub.f32 %v136_v11, %v150_v16 }
 0x19a   :  { %v149_v18 = vpop.xlane.xlu0 %148 }
 0x19b   :  { %v151_v19 = vmul.f32 0.03125, %v149_v18  ;;  %v154_v20 = vmul.f32 %v152_v17, %v152_v17 }
 0x19d   :  { %v153_v21 = vsub.f32 %v141_v12, %v151_v19  ;;  %v156_v22 = vsel %vm62_vm0, %v154_v20, 0.0 }
 0x19e   :  { %157 = vadd.xlane.f32.xlu1 %v156_v22 }
 0x19f   :  { %v155_v23 = vmul.f32 %v153_v21, %v153_v21 }
 0x1a1   :  { %v159_v24 = vsel %vm62_vm0, %v155_v23, 0.0 }
 0x1a2   :  { %160 = vadd.xlane.f32.xlu1 %v159_v24 }
 0x22b   :  { %v158_v25 = vpop.xlane.xlu1 %157 }
 0x22c   :  { %v162_v26 = vmul.f32 0.03125, %v158_v25 }
 0x22e   :  { %v165_v27 = vadd.f32 1e-05, %v162_v26 }
 0x22f   :  { %v161_v28 = vpop.xlane.xlu1 %160 }
 0x230   :  { %245 = vrsqrt.f32 %v165_v27  ;;  %v163_v29 = vmul.f32 0.03125, %v161_v28 }
 0x232   :  { %v166_v30 = vadd.f32 1e-05, %v163_v29 }
 0x234   :  { %247 = vrsqrt.f32 %v166_v30 }
 0x23a   :  { %v246_v32 = vpop.eup %245 }
 0x23b   :  { %v175_v33 = vmul.f32 %v246_v32, %v213_v31 }
 0x23d   :  { %v177_v35 = vmul.f32 %v175_v33, %v152_v17 }
 0x23e   :  { %v248_v36 = vpop.eup %247 }
 0x23f   :  { %v176_v37 = vmul.f32 %v248_v36, %v213_v31  ;;  %v186_v38 = vadd.f32 %v214_v34, %v177_v35 }
 0x241   :  { %v178_v39 = vmul.f32 %v176_v37, %v153_v21  ;;  %v188_v40 = vmax.f32 %v186_v38, 0.0 }
 0x243   :  { %v187_v41 = vadd.f32 %v214_v34, %v178_v39  ;;  %190 = vst.msk [vmem:[#allocation7] sm:$0xff] %vm62_vm0, %v188_v40 }
 0x245   :  { %v189_v42 = vmax.f32 %v187_v41, 0.0 }
 0x247   :  { %191 = vst.msk [vmem:[#allocation7 + $0x8] sm:$0xff] %vm62_vm0, %v189_v42 }
 0x248   :  { %304 = shalt.err (!%p301_p6)
}
 0x249   :  { %s305_s25 = scalar_lea.hbm %s423_s5, 256 }
 0x24a   :  { %p306_p7 = scmp.ne.s32.totalorder %s423_s5, %s305_s25  ;;  %p309_p8 = scmp.lt.u32.totalorder %s305_s25, %s423_s5 }
 0x24c   :  { %p311_p9 = pnand %p309_p8, %p306_p7 }
 0x24e   :  { %314 = shalt.err (!%p311_p9)
}
 0x24f   :  { %203 = dma.vmem_to_hbm [thread:$0]  %s198_s23, 256, %s423_s5, [#allocation4], %s322_s28, %s322_s28, %s323_s29  }
 0x250   :  { %319 = dma.done.wait [#allocation4], 256  }
 0x251   :  { %320 = vsyncadd [#allocation4], 4294967040 }
 0x252   :  { %207 = vsyncpa [#allocation3], 1 }
 0x253   :  { %208 = vsyncpa [#allocation6], 1 }
 0x254   :  { %209 = vsyncpa [#allocation4], 1 }

</bundles_post_ra>
